<compile_context>
chip_gen: v7x
topology: tpu7x:2x2x1
jax: 0.10.0
libtpu: 0.0.40
codegen_flags: <defaults>
</compile_context>

<pallas_src>
import jax
import jax.numpy as jnp
from jax.experimental import pallas as pl
from jax.experimental.pallas import tpu as pltpu


def rnn_kernel(x_ref, w_ref, o_ref):
    # x_ref: ((T+1)*B8, Ip) time-major, 8 rows per timestep, spare col = 1.0,
    #        last timestep block all-zero input (addend for final fused step).
    # w_ref: (Ip + 2*Hp + Hp + B8, 2*Hp) packed slab:
    #        rows [0, Ip)                 : [W_ih0^T | 0]   (+ bias row [b0|b1])
    #        rows [Ip, Ip+2Hp)            : [[W_hh0^T, W_ih1^T], [0, W_hh1^T]]
    #        rows [Ip+2Hp, Ip+2Hp+Hp)     : [W_out^T | 0]
    #        rows [Ip+2Hp+Hp, +B8)        : b_out replicated over 8 sublanes
    # o_ref: (B8, Op)
    B8 = o_ref.shape[0]
    Ip = x_ref.shape[1]
    Hp2 = w_ref.shape[1]
    Hp = Hp2 // 2
    Op = o_ref.shape[1]
    T = x_ref.shape[0] // B8 - 1

    # Static (8,128)-aligned views into the packed weight slab.
    wih0cat = w_ref[0:Ip, :]                                    # (Ip, 2Hp)
    wstep = w_ref[Ip:Ip + Hp2, :]                               # (2Hp, 2Hp)
    wout = w_ref[Ip + Hp2:Ip + Hp2 + Hp, 0:Op]                  # (Hp, Op)
    bout = w_ref[Ip + Hp2 + Hp:Ip + Hp2 + Hp + B8, 0:Op]        # (B8, Op)

    # Layer-0 input projection (+b0) AND the per-step b1 addend for ALL
    # timesteps in one matmul, off the serial critical path:
    #   addend[t*8:(t+1)*8, :Hp]  = x(t) @ W_ih0^T + b0
    #   addend[t*8:(t+1)*8, Hp:]  = b1          (spare ones column * bias row)
    addend = jnp.dot(x_ref[...], wih0cat,
                     preferred_element_type=jnp.float32)        # ((T+1)*8, 2Hp)

    # s_0 = [h0(0), h1(-1)] = [tanh(x0 @ W_ih0^T + b0), 0]
    s = jnp.concatenate(
        [jnp.tanh(addend[0:B8, 0:Hp]), jnp.zeros((B8, Hp), jnp.float32)],
        axis=1)                                                 # (8, 2Hp)

    # Fully unrolled recurrence: ONE fused matmul + ONE tanh per timestep.
    # s_{t+1} = tanh(s_t @ W_step + addend[t+1])
    #         = [h0(t+1), h1(t)]
    for t in range(T):
        m = jnp.dot(s, wstep, preferred_element_type=jnp.float32)
        s = jnp.tanh(m + addend[(t + 1) * B8:(t + 2) * B8, :])

    h1_last = s[:, Hp:]                                         # (8, Hp)
    o_ref[...] = (jnp.dot(h1_last, wout, preferred_element_type=jnp.float32)
                  + bout).astype(o_ref.dtype)


def _round_up(n, m):
    return ((n + m - 1) // m) * m


def reference_model_forward(x, params):
    """x: (B, T, I) float32. Returns (B, O). Matches nn.RNN(2 layers)+Linear."""
    B, T, I = x.shape
    H = params["w_hh0"].shape[0]
    O = params["w_out"].shape[0]

    B8 = max(8, _round_up(B, 8))
    Ip = _round_up(I + 1, 128)          # +1 spare column for folded biases
    Hp = _round_up(H, 128)
    Op = _round_up(O, 128)

    # --- x slab: time-major, 8 sublane rows / timestep, +1 zero timestep ---
    x_tm = jnp.transpose(x, (1, 0, 2))                           # (T, B, I)
    x_pad = jnp.pad(x_tm, ((0, 1), (0, B8 - B), (0, Ip - I)))    # (T+1, B8, Ip)
    x_tb = x_pad.reshape((T + 1) * B8, Ip)
    x_tb = x_tb.at[:, Ip - 1].set(1.0)                           # ones column

    # --- weight slab ---
    # [W_ih0^T | 0] with bias row [b0 | b1] in the spare (ones) input row.
    wih0cat = jnp.zeros((Ip, 2 * Hp), jnp.float32)
    wih0cat = wih0cat.at[:I, :H].set(params["w_ih0"].T)
    wih0cat = wih0cat.at[Ip - 1, :H].set(params["b0"][0])
    wih0cat = wih0cat.at[Ip - 1, Hp:Hp + H].set(params["b1"][0])

    # Fused step matrix [[W_hh0^T, W_ih1^T], [0, W_hh1^T]] (zero block exact).
    wstep = jnp.zeros((2 * Hp, 2 * Hp), jnp.float32)
    wstep = wstep.at[:H, :H].set(params["w_hh0"].T)
    wstep = wstep.at[:H, Hp:Hp + H].set(params["w_ih1"].T)
    wstep = wstep.at[Hp:Hp + H, Hp:Hp + H].set(params["w_hh1"].T)

    # Output head: W_out^T and b_out pre-replicated over 8 sublane rows.
    woutcat = jnp.zeros((Hp, 2 * Hp), jnp.float32)
    woutcat = woutcat.at[:H, :O].set(params["w_out"].T)
    boutcat = jnp.zeros((B8, 2 * Hp), jnp.float32)
    boutcat = boutcat.at[:, :O].set(jnp.broadcast_to(params["b_out"], (B8, O)))

    wslab = jnp.concatenate([wih0cat, wstep, woutcat, boutcat], axis=0)

    full = lambda shape: pl.BlockSpec(shape, lambda: (0,) * len(shape))

    out_padded = pl.pallas_call(
        rnn_kernel,
        out_shape=jax.ShapeDtypeStruct((B8, Op), jnp.float32),
        grid_spec=pltpu.PrefetchScalarGridSpec(
            num_scalar_prefetch=0,
            grid=(),
            in_specs=[full(x_tb.shape), full(wslab.shape)],
            out_specs=full((B8, Op)),
        ),
    )(x_tb, wslab)

    return out_padded[:B, :O]


def make_params(key, input_size, hidden_size, output_size):
    """PyTorch-style uniform init U(-1/sqrt(H), 1/sqrt(H)); deterministic."""
    ks = jax.random.split(key, 12)
    kH = 1.0 / jnp.sqrt(hidden_size)
    u = lambda k, shape, bound: jax.random.uniform(
        k, shape, jnp.float32, minval=-bound, maxval=bound)

    w_ih0 = u(ks[0], (hidden_size, input_size), kH)
    w_hh0 = u(ks[1], (hidden_size, hidden_size), kH)
    b_ih0 = u(ks[2], (1, hidden_size), kH)
    b_hh0 = u(ks[3], (1, hidden_size), kH)
    w_ih1 = u(ks[4], (hidden_size, hidden_size), kH)
    w_hh1 = u(ks[5], (hidden_size, hidden_size), kH)
    b_ih1 = u(ks[6], (1, hidden_size), kH)
    b_hh1 = u(ks[7], (1, hidden_size), kH)
    w_out = u(ks[8], (output_size, hidden_size), kH)
    b_out = u(ks[9], (1, output_size), kH)

    return {
        "w_ih0": w_ih0, "w_hh0": w_hh0, "b0": b_ih0 + b_hh0,
        "w_ih1": w_ih1, "w_hh1": w_hh1, "b1": b_ih1 + b_hh1,
        "w_out": w_out, "b_out": b_out,
    }


def reference_jax(x, params):
    """Pure-JAX reference of the PyTorch module (for correctness check)."""
    B, T, I = x.shape
    H = params["w_hh0"].shape[0]
    h0 = jnp.zeros((B, H), jnp.float32)
    h1 = jnp.zeros((B, H), jnp.float32)
    for t in range(T):
        xt = x[:, t, :]
        h0 = jnp.tanh(xt @ params["w_ih0"].T + h0 @ params["w_hh0"].T + params["b0"])
        h1 = jnp.tanh(h0 @ params["w_ih1"].T + h1 @ params["w_hh1"].T + params["b1"])
    return h1 @ params["w_out"].T + params["b_out"]


if __name__ == "__main__":
    B, T, I, H, O = 2, 8, 16, 32, 10

    key = jax.random.PRNGKey(0)
    kx, kp = jax.random.split(key)
    x = jax.random.normal(kx, (B, T, I), dtype=jnp.float32)
    params = make_params(kp, I, H, O)

    out = reference_model_forward(x, params)
    out = jax.block_until_ready(out)

    ref = reference_jax(x, params)
    assert out.shape == (B, O)
    assert jnp.allclose(out, ref, atol=1e-5, rtol=1e-5), "mismatch vs JAX reference"

    print("KERNEL_OK")
</pallas_src>

<mosaic_0001>
module attributes {stable_mosaic.version = 11 : i64} {
  func.func @rnn_kernel(%arg0: memref<72x128xf32, #tpu.memory_space<vmem>>, %arg1: memref<520x256xf32, #tpu.memory_space<vmem>>, %arg2: memref<8x128xf32, #tpu.memory_space<vmem>>) attributes {dimension_semantics = [], scalar_prefetch = 0 : i64, scratch_operands = 0 : i64, tpu.core_type = #tpu.core_type<tc>} {
    %c0 = arith.constant 0 : index
    %c0_0 = arith.constant 0 : index
    %0 = vector.load %arg1[%c0, %c0_0] : memref<520x256xf32, #tpu.memory_space<vmem>>, vector<128x256xf32>
    %c128 = arith.constant 128 : index
    %c0_1 = arith.constant 0 : index
    %1 = vector.load %arg1[%c128, %c0_1] : memref<520x256xf32, #tpu.memory_space<vmem>>, vector<256x256xf32>
    %c384 = arith.constant 384 : index
    %c0_2 = arith.constant 0 : index
    %2 = vector.load %arg1[%c384, %c0_2] : memref<520x256xf32, #tpu.memory_space<vmem>>, vector<128x128xf32>
    %c512 = arith.constant 512 : index
    %c0_3 = arith.constant 0 : index
    %3 = vector.load %arg1[%c512, %c0_3] : memref<520x256xf32, #tpu.memory_space<vmem>>, vector<8x128xf32>
    %c0_4 = arith.constant 0 : index
    %c0_5 = arith.constant 0 : index
    %4 = vector.load %arg0[%c0_4, %c0_5] : memref<72x128xf32, #tpu.memory_space<vmem>>, vector<72x128xf32>
    %cst = arith.constant dense<0.000000e+00> : vector<72x256xf32>
    %5 = tpu.matmul %4, %0, %cst {dimension_numbers = #tpu.dot_dimension_numbers<[1], [0], [0], [1], [0, 0, 1, 1], [], []>} : vector<72x128xf32>, vector<128x256xf32>, vector<72x256xf32> -> vector<72x256xf32>
    %6 = vector.extract_strided_slice %5 {offsets = [0, 0], sizes = [8, 128], strides = [1, 1]} : vector<72x256xf32> to vector<8x128xf32>
    %7 = math.tanh %6 : vector<8x128xf32>
    %cst_6 = arith.constant 0.000000e+00 : f32
    %8 = vector.broadcast %cst_6 : f32 to vector<8x128xf32>
    %9 = tpu.concatenate %7, %8 in 1 : vector<8x128xf32>, vector<8x128xf32> -> vector<8x256xf32>
    %cst_7 = arith.constant dense<0.000000e+00> : vector<8x256xf32>
    %10 = tpu.matmul %9, %1, %cst_7 {dimension_numbers = #tpu.dot_dimension_numbers<[1], [0], [0], [1], [0, 0, 1, 1], [], []>} : vector<8x256xf32>, vector<256x256xf32>, vector<8x256xf32> -> vector<8x256xf32>
    %11 = vector.extract_strided_slice %5 {offsets = [8, 0], sizes = [8, 256], strides = [1, 1]} : vector<72x256xf32> to vector<8x256xf32>
    %12 = arith.addf %10, %11 : vector<8x256xf32>
    %13 = math.tanh %12 : vector<8x256xf32>
    %cst_8 = arith.constant dense<0.000000e+00> : vector<8x256xf32>
    %14 = tpu.matmul %13, %1, %cst_8 {dimension_numbers = #tpu.dot_dimension_numbers<[1], [0], [0], [1], [0, 0, 1, 1], [], []>} : vector<8x256xf32>, vector<256x256xf32>, vector<8x256xf32> -> vector<8x256xf32>
    %15 = vector.extract_strided_slice %5 {offsets = [16, 0], sizes = [8, 256], strides = [1, 1]} : vector<72x256xf32> to vector<8x256xf32>
    %16 = arith.addf %14, %15 : vector<8x256xf32>
    %17 = math.tanh %16 : vector<8x256xf32>
    %cst_9 = arith.constant dense<0.000000e+00> : vector<8x256xf32>
    %18 = tpu.matmul %17, %1, %cst_9 {dimension_numbers = #tpu.dot_dimension_numbers<[1], [0], [0], [1], [0, 0, 1, 1], [], []>} : vector<8x256xf32>, vector<256x256xf32>, vector<8x256xf32> -> vector<8x256xf32>
    %19 = vector.extract_strided_slice %5 {offsets = [24, 0], sizes = [8, 256], strides = [1, 1]} : vector<72x256xf32> to vector<8x256xf32>
    %20 = arith.addf %18, %19 : vector<8x256xf32>
    %21 = math.tanh %20 : vector<8x256xf32>
    %cst_10 = arith.constant dense<0.000000e+00> : vector<8x256xf32>
    %22 = tpu.matmul %21, %1, %cst_10 {dimension_numbers = #tpu.dot_dimension_numbers<[1], [0], [0], [1], [0, 0, 1, 1], [], []>} : vector<8x256xf32>, vector<256x256xf32>, vector<8x256xf32> -> vector<8x256xf32>
    %23 = vector.extract_strided_slice %5 {offsets = [32, 0], sizes = [8, 256], strides = [1, 1]} : vector<72x256xf32> to vector<8x256xf32>
    %24 = arith.addf %22, %23 : vector<8x256xf32>
    %25 = math.tanh %24 : vector<8x256xf32>
    %cst_11 = arith.constant dense<0.000000e+00> : vector<8x256xf32>
    %26 = tpu.matmul %25, %1, %cst_11 {dimension_numbers = #tpu.dot_dimension_numbers<[1], [0], [0], [1], [0, 0, 1, 1], [], []>} : vector<8x256xf32>, vector<256x256xf32>, vector<8x256xf32> -> vector<8x256xf32>
    %27 = vector.extract_strided_slice %5 {offsets = [40, 0], sizes = [8, 256], strides = [1, 1]} : vector<72x256xf32> to vector<8x256xf32>
    %28 = arith.addf %26, %27 : vector<8x256xf32>
    %29 = math.tanh %28 : vector<8x256xf32>
    %cst_12 = arith.constant dense<0.000000e+00> : vector<8x256xf32>
    %30 = tpu.matmul %29, %1, %cst_12 {dimension_numbers = #tpu.dot_dimension_numbers<[1], [0], [0], [1], [0, 0, 1, 1], [], []>} : vector<8x256xf32>, vector<256x256xf32>, vector<8x256xf32> -> vector<8x256xf32>
    %31 = vector.extract_strided_slice %5 {offsets = [48, 0], sizes = [8, 256], strides = [1, 1]} : vector<72x256xf32> to vector<8x256xf32>
    %32 = arith.addf %30, %31 : vector<8x256xf32>
    %33 = math.tanh %32 : vector<8x256xf32>
    %cst_13 = arith.constant dense<0.000000e+00> : vector<8x256xf32>
    %34 = tpu.matmul %33, %1, %cst_13 {dimension_numbers = #tpu.dot_dimension_numbers<[1], [0], [0], [1], [0, 0, 1, 1], [], []>} : vector<8x256xf32>, vector<256x256xf32>, vector<8x256xf32> -> vector<8x256xf32>
    %35 = vector.extract_strided_slice %5 {offsets = [56, 0], sizes = [8, 256], strides = [1, 1]} : vector<72x256xf32> to vector<8x256xf32>
    %36 = arith.addf %34, %35 : vector<8x256xf32>
    %37 = math.tanh %36 : vector<8x256xf32>
    %cst_14 = arith.constant dense<0.000000e+00> : vector<8x256xf32>
    %38 = tpu.matmul %37, %1, %cst_14 {dimension_numbers = #tpu.dot_dimension_numbers<[1], [0], [0], [1], [0, 0, 1, 1], [], []>} : vector<8x256xf32>, vector<256x256xf32>, vector<8x256xf32> -> vector<8x256xf32>
    %39 = vector.extract_strided_slice %5 {offsets = [64, 0], sizes = [8, 256], strides = [1, 1]} : vector<72x256xf32> to vector<8x256xf32>
    %40 = arith.addf %38, %39 : vector<8x256xf32>
    %41 = math.tanh %40 : vector<8x256xf32>
    %42 = vector.extract_strided_slice %41 {offsets = [0, 128], sizes = [8, 128], strides = [1, 1]} : vector<8x256xf32> to vector<8x128xf32>
    %cst_15 = arith.constant dense<0.000000e+00> : vector<8x128xf32>
    %43 = tpu.matmul %42, %2, %cst_15 {dimension_numbers = #tpu.dot_dimension_numbers<[1], [0], [0], [1], [0, 0, 1, 1], [], []>} : vector<8x128xf32>, vector<128x128xf32>, vector<8x128xf32> -> vector<8x128xf32>
    %44 = arith.addf %43, %3 : vector<8x128xf32>
    %c0_16 = arith.constant 0 : index
    %c0_17 = arith.constant 0 : index
    %45 = vector.load %arg2[%c0_16, %c0_17] : memref<8x128xf32, #tpu.memory_space<vmem>>, vector<8x128xf32>
    tpu.vector_store %arg2[%c0_16, %c0_17], %44 {strides = array<i32>} : memref<8x128xf32, #tpu.memory_space<vmem>>, vector<8x128xf32>,
    return
  }
}

</mosaic_0001>

<bundles_post_ra>
// kernel: tpu_custom_call.1
= control target key start
LH: loop header
LB: loop body
LE: loop exit
PB: predicated region body
PF: predicated region fallthrough
CT: control target
= control target key end

     0   :  { %7 = vsyncpa [#allocation3], 0  ;;  %s2091_s0 = inlined_call_operand.hbm [shape: f32[72,128], index: 0, kind: input, shape index: {}]   ;;  %s2092_s1 = inlined_call_operand.hbm [shape: f32[520,256], index: 1, kind: input, shape index: {}]   ;;  %s2093_s2 = inlined_call_operand.hbm [shape: f32[8,128], index: 2, kind: output, shape index: {}]  }
   0x1   :  { %8 = vsyncpa [#allocation6], 0 }
   0x2   :  { %9 = vsyncpa [#allocation4], 0  ;;  %s1699_s9 = smov [#allocation2]   ;;  %s1627_s13 = scalar_lea.hbm %s2091_s0, 1152 }
   0x3   :  { %s15_s10 = sshll.u32 %s1699_s9, 4  ;;  %p1628_p0 = scmp.ne.s32.totalorder %s2091_s0, %s1627_s13  ;;  %s16_s10 = int_to_ptr.vmem [resolvable:$true] %s15_s10 }
   0x4   :  { %p1631_p1 = scmp.lt.u32.totalorder %s1627_s13, %s2091_s0 }
   0x6   :  { %p1633_p2 = pnand %p1631_p1, %p1628_p0 }
   0x8   :  { %1636 = shalt.err (!%p1633_p2)
}
   0x9   :  { %s1637_s18 = scalar_lea.vmem %s16_s10, 1152  ;;  %p1642_p4 = scmp.lt.s32.totalorder %s16_s10, %s16_s10 }
   0xa   :  { %p1638_p3 = scmp.ne.s32.totalorder %s16_s10, %s1637_s18  ;;  %p1643_p5 = scmp.lt.s32.totalorder %s1637_s18, %s1637_s18 }
   0xc   :  { %p1644_p6 = por %p1643_p5, %p1642_p4 }
   0xe   :  { %p1645_p7 = pnand %p1644_p6, %p1638_p3 }
  0x10   :  { %1648 = shalt.err (!%p1645_p7)
}
  0x11   :  { %s1700_s19 = smov 128   ;;  %s1701_s20 = smov 8  }
  0x12   :  { %21 = dma.hbm_to_vmem [thread:$0]  %s2091_s0, 1152, %s16_s10, [#allocation3], %s1700_s19, %s1700_s19, %s1701_s20  }
  0x13   :  { %s1702_s23 = smov [#allocation5]   ;;  %s1649_s27 = scalar_lea.hbm %s2092_s1, 16640 }
  0x14   :  { %s27_s24 = sshll.u32 %s1702_s23, 4  ;;  %p1650_p8 = scmp.ne.s32.totalorder %s2092_s1, %s1649_s27  ;;  %s28_s24 = int_to_ptr.vmem [resolvable:$true] %s27_s24 }
  0x15   :  { %p1653_p9 = scmp.lt.u32.totalorder %s1649_s27, %s2092_s1 }
  0x17   :  { %p1655_p10 = pnand %p1653_p9, %p1650_p8 }
  0x19   :  { %1658 = shalt.err (!%p1655_p10)
}
  0x1a   :  { %s1659_s4 = scalar_lea.vmem %s28_s24, 16640  ;;  %p1664_p12 = scmp.lt.s32.totalorder %s28_s24, %s28_s24 }
  0x1b   :  { %p1660_p11 = scmp.ne.s32.totalorder %s28_s24, %s1659_s4  ;;  %p1665_p13 = scmp.lt.s32.totalorder %s1659_s4, %s1659_s4 }
  0x1d   :  { %p1666_p0 = por %p1665_p13, %p1664_p12 }
  0x1f   :  { %p1667_p1 = pnand %p1666_p0, %p1660_p11 }
  0x21   :  { %1670 = shalt.err (!%p1667_p1)
}
  0x22   :  { %s1703_s0 = smov 256   ;;  %s1704_s5 = smov 16  }
  0x23   :  { %33 = dma.hbm_to_vmem [thread:$0]  %s2092_s1, 16640, %s28_s24, [#allocation6], %s1703_s0, %s1703_s0, %s1704_s5  }
  0x24   :  { %1693 = dma.done.wait [#allocation3], 1152  }
  0x25   :  { %1694 = vsyncadd [#allocation3], 4294966144 }
  0x26   :  { %1695 = dma.done.wait [#allocation6], 16640  }
  0x27   :  { %1696 = vsyncadd [#allocation6], 4294950656  ;;  %v1705_v0 = vmov 0.0   ;;  %v41_v1 = vld [vmem:[#allocation5 + $0x8] sm:$0xff]  ;;  %v43_v2 = vld [vmem:[#allocation5 + $0x18] sm:$0xff]  ;;  %vm1707_vm0 = vmmov 0  }
  0x28   :  { %226 = vmatprep.mubr.f32.mxu0 %v1705_v0  ;;  %344 = vmatprep.mubr.f32.mxu1 %v1705_v0  ;;  %v40_v3 = vld [vmem:[#allocation5] sm:$0xff]  ;;  %v1001_v4 = vpack.c.bf16 %v43_v2, %v41_v1  ;;  %v42_v5 = vld [vmem:[#allocation5 + $0x10] sm:$0xff]  ;;  %v45_v6 = vld [vmem:[#allocation5 + $0x28] sm:$0xff]  ;;  %s1708_s1 = smov [#allocation7]  }
  0x29   :  { %v47_v7 = vld [vmem:[#allocation5 + $0x38] sm:$0xff]  ;;  %v1003_v8 = vpack.c.bf16 %v42_v5, %v40_v3  ;;  %v44_v10 = vld [vmem:[#allocation5 + $0x20] sm:$0xff]  ;;  %v46_v11 = vld [vmem:[#allocation5 + $0x30] sm:$0xff]  ;;  %s939_s8 = sshll.u32 %s1708_s1, 4  ;;  %s940_s8 = int_to_ptr.vmem [resolvable:$true] %s939_s8 }
  0x2a   :  { %v1005_v9 = vpack.c.bf16 %v47_v7, %v45_v6  ;;  %v49_v12 = vld [vmem:[#allocation5 + $0x48] sm:$0xff]  ;;  %1002 = vmatprep.subr.bf16.mxu0 %v1001_v4  ;;  %v51_v13 = vld [vmem:[#allocation5 + $0x58] sm:$0xff]  ;;  %v1007_v14 = vpack.c.bf16 %v46_v11, %v44_v10  ;;  %v48_v16 = vld [vmem:[#allocation5 + $0x40] sm:$0xff]  ;;  %s1671_s9 = scalar_lea.vmem %s940_s8, 128  ;;  %p1676_p3 = scmp.lt.s32.totalorder %s940_s8, %s940_s8 }
  0x2b   :  { %1004 = vmatpush1.bf16.msra.mxu0 %v1003_v8  ;;  %v1009_v15 = vpack.c.bf16 %v51_v13, %v49_v12  ;;  %v50_v17 = vld [vmem:[#allocation5 + $0x50] sm:$0xff]  ;;  %v53_v18 = vld [vmem:[#allocation5 + $0x68] sm:$0xff]  ;;  %v55_v19 = vld [vmem:[#allocation5 + $0x78] sm:$0xff]  ;;  %p1672_p2 = scmp.ne.s32.totalorder %s940_s8, %s1671_s9  ;;  %p1677_p4 = scmp.lt.s32.totalorder %s1671_s9, %s1671_s9 }
  0x2c   :  { %1006 = vmatprep.subr.bf16.mxu0 %v1005_v9  ;;  %v1011_v20 = vpack.c.bf16 %v50_v17, %v48_v16  ;;  %v1013_v21 = vpack.c.bf16 %v55_v19, %v53_v18  ;;  %v52_v22 = vld [vmem:[#allocation5 + $0x60] sm:$0xff]  ;;  %v54_v23 = vld [vmem:[#allocation5 + $0x70] sm:$0xff]  ;;  %v57_v24 = vld [vmem:[#allocation5 + $0x88] sm:$0xff] }
  0x2d   :  { %v59_v25 = vld [vmem:[#allocation5 + $0x98] sm:$0xff]  ;;  %v56_v26 = vld [vmem:[#allocation5 + $0x80] sm:$0xff]  ;;  %v58_v27 = vld [vmem:[#allocation5 + $0x90] sm:$0xff]  ;;  %v1015_v31 = vpack.c.bf16 %v54_v23, %v52_v22  ;;  %p1678_p5 = por %p1677_p4, %p1676_p3 }
  0x2e   :  { %v73_v28 = vld [vmem:[#allocation5 + $0x108] sm:$0xff]  ;;  %v75_v29 = vld [vmem:[#allocation5 + $0x118] sm:$0xff]  ;;  %v72_v30 = vld [vmem:[#allocation5 + $0x100] sm:$0xff]  ;;  %v1017_v36 = vpack.c.bf16 %v59_v25, %v57_v24  ;;  %v1019_v46 = vpack.c.bf16 %v58_v27, %v56_v26 }
  0x2f   :  { %1008 = vmatpush1.bf16.msra.mxu0 %v1007_v14  ;;  %v1750_v32 = vpack.c.bf16 %v75_v29, %v73_v28  ;;  %v74_v33 = vld [vmem:[#allocation5 + $0x110] sm:$0xff]  ;;  %v77_v34 = vld [vmem:[#allocation5 + $0x128] sm:$0xff]  ;;  %v79_v35 = vld [vmem:[#allocation5 + $0x138] sm:$0xff]  ;;  %p1679_p6 = pnand %p1678_p5, %p1672_p2 }
  0x30   :  { %1010 = vmatprep.subr.bf16.mxu0 %v1009_v15  ;;  %v1752_v37 = vpack.c.bf16 %v74_v33, %v72_v30  ;;  %v1754_v38 = vpack.c.bf16 %v79_v35, %v77_v34  ;;  %v76_v39 = vld [vmem:[#allocation5 + $0x120] sm:$0xff]  ;;  %v78_v40 = vld [vmem:[#allocation5 + $0x130] sm:$0xff]  ;;  %v81_v41 = vld [vmem:[#allocation5 + $0x148] sm:$0xff] }
  0x31   :  { %v61_v42 = vld [vmem:[#allocation5 + $0xa8] sm:$0xff]  ;;  %v63_v43 = vld [vmem:[#allocation5 + $0xb8] sm:$0xff]  ;;  %1034 = vmatprep.subr.bf16.mxu1 %v1750_v32  ;;  %v1758_v45 = vpack.c.bf16 %v78_v40, %v76_v39  ;;  %v60_v47 = vld [vmem:[#allocation5 + $0xa0] sm:$0xff] }
  0x32   :  { %v83_v44 = vld [vmem:[#allocation5 + $0x158] sm:$0xff]  ;;  %1036 = vmatpush1.bf16.msra.mxu1 %v1752_v37  ;;  %v80_v49 = vld [vmem:[#allocation5 + $0x140] sm:$0xff]  ;;  %v82_v50 = vld [vmem:[#allocation5 + $0x150] sm:$0xff]  ;;  %v1021_v51 = vpack.c.bf16 %v63_v43, %v61_v42 }
  0x33   :  { %1012 = vmatpush1.bf16.msra.mxu0 %v1011_v20  ;;  %1038 = vmatprep.subr.bf16.mxu1 %v1754_v38  ;;  %v1761_v48 = vpack.c.bf16 %v83_v44, %v81_v41  ;;  %v62_v52 = vld [vmem:[#allocation5 + $0xb0] sm:$0xff]  ;;  %v85_v53 = vld [vmem:[#allocation5 + $0x168] sm:$0xff]  ;;  %v87_v54 = vld [vmem:[#allocation5 + $0x178] sm:$0xff]  ;;  %v1764_v57 = vpack.c.bf16 %v82_v50, %v80_v49 }
  0x34   :  { %1014 = vmatprep.subr.bf16.mxu0 %v1013_v21  ;;  %v65_v55 = vld [vmem:[#allocation5 + $0xc8] sm:$0xff]  ;;  %v67_v56 = vld [vmem:[#allocation5 + $0xd8] sm:$0xff]  ;;  %v1023_v58 = vpack.c.bf16 %v62_v52, %v60_v47  ;;  %v64_v59 = vld [vmem:[#allocation5 + $0xc0] sm:$0xff]  ;;  %v1767_v60 = vpack.c.bf16 %v87_v54, %v85_v53 }
  0x35   :  { %v84_v61 = vld [vmem:[#allocation5 + $0x160] sm:$0xff]  ;;  %v86_v62 = vld [vmem:[#allocation5 + $0x170] sm:$0xff]  ;;  %v1025_v63 = vpack.c.bf16 %v67_v56, %v65_v55  ;;  %v89_v2 = vld [vmem:[#allocation5 + $0x188] sm:$0xff] }
  0x36   :  { %1040 = vmatpush1.bf16.msra.mxu1 %v1758_v45  ;;  %v66_v1 = vld [vmem:[#allocation5 + $0xd0] sm:$0xff]  ;;  %v91_v3 = vld [vmem:[#allocation5 + $0x198] sm:$0xff]  ;;  %v69_v4 = vld [vmem:[#allocation5 + $0xe8] sm:$0xff]  ;;  %v1770_v6 = vpack.c.bf16 %v86_v62, %v84_v61 }
  0x37   :  { %1016 = vmatpush1.bf16.msra.mxu0 %v1015_v31  ;;  %1042 = vmatprep.subr.bf16.mxu1 %v1761_v48  ;;  %v71_v5 = vld [vmem:[#allocation5 + $0xf8] sm:$0xff]  ;;  %v1027_v7 = vpack.c.bf16 %v66_v1, %v64_v59  ;;  %v68_v8 = vld [vmem:[#allocation5 + $0xe0] sm:$0xff]  ;;  %v1773_v9 = vpack.c.bf16 %v91_v3, %v89_v2  ;;  %v90_v11 = vld [vmem:[#allocation5 + $0x190] sm:$0xff] }
  0x38   :  { %1018 = vmatprep.subr.bf16.mxu0 %v1017_v36  ;;  %v88_v10 = vld [vmem:[#allocation5 + $0x180] sm:$0xff]  ;;  %v1029_v12 = vpack.c.bf16 %v71_v5, %v69_v4  ;;  %v70_v13 = vld [vmem:[#allocation5 + $0xf0] sm:$0xff]  ;;  %v93_v14 = vld [vmem:[#allocation5 + $0x1a8] sm:$0xff] }
  0x39   :  { %v95_v15 = vld [vmem:[#allocation5 + $0x1b8] sm:$0xff]  ;;  %v1776_v16 = vpack.c.bf16 %v90_v11, %v88_v10  ;;  %v1031_v17 = vpack.c.bf16 %v70_v13, %v68_v8  ;;  %v92_v19 = vld [vmem:[#allocation5 + $0x1a0] sm:$0xff]  ;;  %v94_v20 = vld [vmem:[#allocation5 + $0x1b0] sm:$0xff] }
  0x3a   :  { %1044 = vmatpush1.bf16.msra.mxu1 %v1764_v57  ;;  %v1779_v18 = vpack.c.bf16 %v95_v15, %v93_v14  ;;  %v97_v21 = vld [vmem:[#allocation5 + $0x1c8] sm:$0xff]  ;;  %v99_v22 = vld [vmem:[#allocation5 + $0x1d8] sm:$0xff]  ;;  %v1782_v23 = vpack.c.bf16 %v94_v20, %v92_v19  ;;  %v96_v26 = vld [vmem:[#allocation5 + $0x1c0] sm:$0xff] }
  0x3b   :  { %1020 = vmatpush1.bf16.msra.mxu0 %v1019_v46  ;;  %1046 = vmatprep.subr.bf16.mxu1 %v1767_v60  ;;  %v153_v24 = vld [vmem:[#allocation2] sm:$0xff]  ;;  %v1785_v25 = vpack.c.bf16 %v99_v22, %v97_v21  ;;  %v98_v27 = vld [vmem:[#allocation5 + $0x1d0] sm:$0xff]  ;;  %v101_v28 = vld [vmem:[#allocation5 + $0x1e8] sm:$0xff] }
  0x3c   :  { %1022 = vmatprep.subr.bf16.mxu0 %v1021_v51  ;;  %v103_v29 = vld [vmem:[#allocation5 + $0x1f8] sm:$0xff]  ;;  %v1789_v30 = vpack.c.bf16 %v98_v27, %v96_v26  ;;  %v100_v33 = vld [vmem:[#allocation5 + $0x1e0] sm:$0xff]  ;;  %v102_v34 = vld [vmem:[#allocation5 + $0x1f0] sm:$0xff] }
  0x3d   :  { %v1792_v31 = vpack.c.bf16 %v103_v29, %v101_v28  ;;  %v105_v35 = vld [vmem:[#allocation5 + $0x208] sm:$0xff]  ;;  %v107_v36 = vld [vmem:[#allocation5 + $0x218] sm:$0xff]  ;;  %v1798_v39 = vpack.c.bf16 %v102_v34, %v100_v33  ;;  %v104_v41 = vld [vmem:[#allocation5 + $0x200] sm:$0xff] }
  0x3e   :  { %1048 = vmatpush1.bf16.msra.mxu1 %v1770_v6  ;;  %v1801_v40 = vpack.c.bf16 %v107_v36, %v105_v35  ;;  %v106_v42 = vld [vmem:[#allocation5 + $0x210] sm:$0xff]  ;;  %v109_v43 = vld [vmem:[#allocation5 + $0x228] sm:$0xff]  ;;  %v111_v44 = vld [vmem:[#allocation5 + $0x238] sm:$0xff] }
  0x3f   :  { %1024 = vmatpush1.bf16.msra.mxu0 %v1023_v58  ;;  %1050 = vmatprep.subr.bf16.mxu1 %v1773_v9  ;;  %v1806_v46 = vpack.c.bf16 %v106_v42, %v104_v41  ;;  %v1809_v47 = vpack.c.bf16 %v111_v44, %v109_v43  ;;  %v108_v49 = vld [vmem:[#allocation5 + $0x220] sm:$0xff]  ;;  %v110_v50 = vld [vmem:[#allocation5 + $0x230] sm:$0xff]  ;;  %v113_v51 = vld [vmem:[#allocation5 + $0x248] sm:$0xff] }
  0x40   :  { %1026 = vmatprep.subr.bf16.mxu0 %v1025_v63  ;;  %v115_v52 = vld [vmem:[#allocation5 + $0x258] sm:$0xff]  ;;  %v1814_v53 = vpack.c.bf16 %v110_v50, %v108_v49  ;;  %v112_v55 = vld [vmem:[#allocation5 + $0x240] sm:$0xff]  ;;  %v114_v56 = vld [vmem:[#allocation5 + $0x250] sm:$0xff] }
  0x41   :  { %v1817_v54 = vpack.c.bf16 %v115_v52, %v113_v51  ;;  %v117_v58 = vld [vmem:[#allocation5 + $0x268] sm:$0xff]  ;;  %v119_v59 = vld [vmem:[#allocation5 + $0x278] sm:$0xff]  ;;  %v1822_v61 = vpack.c.bf16 %v114_v56, %v112_v55  ;;  %v116_v63 = vld [vmem:[#allocation5 + $0x260] sm:$0xff] }
  0x42   :  { %1052 = vmatpush1.bf16.msra.mxu1 %v1776_v16  ;;  %v1825_v62 = vpack.c.bf16 %v119_v59, %v117_v58  ;;  %v118_v1 = vld [vmem:[#allocation5 + $0x270] sm:$0xff]  ;;  %v121_v2 = vld [vmem:[#allocation5 + $0x288] sm:$0xff]  ;;  %v123_v3 = vld [vmem:[#allocation5 + $0x298] sm:$0xff] }
  0x43   :  { %1028 = vmatpush1.bf16.msra.mxu0 %v1027_v7  ;;  %1054 = vmatprep.subr.bf16.mxu1 %v1779_v18  ;;  %v1830_v4 = vpack.c.bf16 %v118_v1, %v116_v63  ;;  %v1833_v5 = vpack.c.bf16 %v123_v3, %v121_v2  ;;  %v120_v7 = vld [vmem:[#allocation5 + $0x280] sm:$0xff]  ;;  %v122_v8 = vld [vmem:[#allocation5 + $0x290] sm:$0xff]  ;;  %v125_v11 = vld [vmem:[#allocation5 + $0x2a8] sm:$0xff] }
  0x44   :  { %1030 = vmatprep.subr.bf16.mxu0 %v1029_v12  ;;  %v1838_v10 = vpack.c.bf16 %v122_v8, %v120_v7  ;;  %v127_v12 = vld [vmem:[#allocation5 + $0x2b8] sm:$0xff]  ;;  %v124_v14 = vld [vmem:[#allocation5 + $0x2a0] sm:$0xff]  ;;  %v126_v15 = vld [vmem:[#allocation5 + $0x2b0] sm:$0xff] }
  0x45   :  { %v1855_v13 = vpack.c.bf16 %v127_v12, %v125_v11  ;;  %v129_v19 = vld [vmem:[#allocation5 + $0x2c8] sm:$0xff]  ;;  %v131_v20 = vld [vmem:[#allocation5 + $0x2d8] sm:$0xff]  ;;  %v128_v21 = vld [vmem:[#allocation5 + $0x2c0] sm:$0xff] }
  0x46   :  { %1056 = vmatpush1.bf16.msra.mxu1 %v1782_v23  ;;  %v1863_v22 = vpack.c.bf16 %v131_v20, %v129_v19  ;;  %v133_v26 = vld [vmem:[#allocation5 + $0x2e8] sm:$0xff]  ;;  %v135_v27 = vld [vmem:[#allocation5 + $0x2f8] sm:$0xff]  ;;  %v132_v33 = vld [vmem:[#allocation5 + $0x2e0] sm:$0xff] }
  0x47   :  { %1032 = vmatpush1.bf16.msra.mxu0 %v1031_v17  ;;  %1058 = vmatprep.subr.bf16.mxu1 %v1785_v25  ;;  %v1857_v17 = vpack.c.bf16 %v126_v15, %v124_v14  ;;  %v1867_v29 = vpack.c.bf16 %v135_v27, %v133_v26  ;;  %v134_v34 = vld [vmem:[#allocation5 + $0x2f0] sm:$0xff]  ;;  %v154_v35 = vld [vmem:[#allocation2 + $0x8] sm:$0xff]  ;;  %v155_v50 = vld [vmem:[#allocation2 + $0x10] sm:$0xff] }
  0x48   :  { %1290 = vmatprep.subr.bf16.mxu0 %v1750_v32  ;;  %v1871_v36 = vpack.c.bf16 %v134_v34, %v132_v33  ;;  %v156_v2 = vld [vmem:[#allocation2 + $0x18] sm:$0xff]  ;;  %v157_v20 = vld [vmem:[#allocation2 + $0x20] sm:$0xff] }
  0x4a   :  { %227 = vmatmul.mubr.f32.vlgmr.msra.gmra.mrb[0].mxu0 %v153_v24  ;;  %1060 = vmatpush1.bf16.msra.mxu1 %v1789_v30  ;;  %v130_v24 = vld [vmem:[#allocation5 + $0x2d0] sm:$0xff] }
  0x4b   :  { %231 = vmatprep.mubr.f32.mxu0 %v1705_v0  ;;  %1292 = vmatpush1.bf16.msra.mxu0 %v1752_v37  ;;  %v1865_v28 = vpack.c.bf16 %v130_v24, %v128_v21  ;;  %v158_v21 = vld [vmem:[#allocation2 + $0x28] sm:$0xff] }
  0x4c   :  { %1294 = vmatprep.subr.bf16.mxu0 %v1754_v38  ;;  %1062 = vmatprep.subr.bf16.mxu1 %v1792_v31 }
  0x4e   :  { %1064 = vmatpush1.bf16.msra.mxu1 %v1798_v39  ;;  %232 = vmatmul.mubr.f32.gmra.mrb[2].mxu0 %v154_v35 }
  0x4f   :  { %1296 = vmatpush1.bf16.msra.mxu0 %v1758_v45  ;;  %1066 = vmatprep.subr.bf16.mxu1 %v1801_v40 }
  0x50   :  { %1298 = vmatprep.subr.bf16.mxu0 %v1761_v48  ;;  %237 = vmatprep.mubr.f32.mxu0 %v1705_v0 }
  0x52   :  { %1068 = vmatpush1.bf16.msra.mxu1 %v1806_v46  ;;  %238 = vmatmul.mubr.f32.gmra.mrb[4].mxu0 %v155_v50 }
  0x53   :  { %1300 = vmatpush1.bf16.msra.mxu0 %v1764_v57  ;;  %1070 = vmatprep.subr.bf16.mxu1 %v1809_v47 }
  0x54   :  { %1302 = vmatprep.subr.bf16.mxu0 %v1767_v60  ;;  %243 = vmatprep.mubr.f32.mxu0 %v1705_v0 }
  0x56   :  { %1072 = vmatpush1.bf16.msra.mxu1 %v1814_v53  ;;  %244 = vmatmul.mubr.f32.gmra.mrb[6].mxu0 %v156_v2 }
  0x57   :  { %1304 = vmatpush1.bf16.msra.mxu0 %v1770_v6  ;;  %1074 = vmatprep.subr.bf16.mxu1 %v1817_v54 }
  0x58   :  { %1306 = vmatprep.subr.bf16.mxu0 %v1773_v9  ;;  %249 = vmatprep.mubr.f32.mxu0 %v1705_v0 }
  0x5a   :  { %1076 = vmatpush1.bf16.msra.mxu1 %v1822_v61  ;;  %250 = vmatmul.mubr.f32.gmra.mrb[8].mxu0 %v157_v20 }
  0x5b   :  { %1308 = vmatpush1.bf16.msra.mxu0 %v1776_v16  ;;  %1078 = vmatprep.subr.bf16.mxu1 %v1825_v62 }
  0x5c   :  { %1310 = vmatprep.subr.bf16.mxu0 %v1779_v18  ;;  %255 = vmatprep.mubr.f32.mxu0 %v1705_v0 }
  0x5e   :  { %1080 = vmatpush1.bf16.msra.mxu1 %v1830_v4  ;;  %256 = vmatmul.mubr.f32.gmra.mrb[10].mxu0 %v158_v21 }
  0x5f   :  { %1312 = vmatpush1.bf16.msra.mxu0 %v1782_v23  ;;  %1082 = vmatprep.subr.bf16.mxu1 %v1833_v5 }
  0x60   :  { %1314 = vmatprep.subr.bf16.mxu0 %v1785_v25  ;;  %261 = vmatprep.mubr.f32.mxu0 %v1705_v0 }
  0x62   :  { %1084 = vmatpush1.bf16.msra.mxu1 %v1838_v10 }
  0x63   :  { %1316 = vmatpush1.bf16.msra.mxu0 %v1789_v30  ;;  %1086 = vmatprep.subr.bf16.mxu1 %v1855_v13 }
  0x64   :  { %1318 = vmatprep.subr.bf16.mxu0 %v1792_v31 }
  0x66   :  { %1088 = vmatpush1.bf16.msra.mxu1 %v1857_v17 }
  0x67   :  { %1320 = vmatpush1.bf16.msra.mxu0 %v1798_v39  ;;  %1090 = vmatprep.subr.bf16.mxu1 %v1863_v22 }
  0x68   :  { %1322 = vmatprep.subr.bf16.mxu0 %v1801_v40 }
  0x6a   :  { %1092 = vmatpush1.bf16.msra.mxu1 %v1865_v28 }
  0x6b   :  { %1324 = vmatpush1.bf16.msra.mxu0 %v1806_v46  ;;  %1094 = vmatprep.subr.bf16.mxu1 %v1867_v29 }
  0x6c   :  { %1326 = vmatprep.subr.bf16.mxu0 %v1809_v47 }
  0x6e   :  { %1096 = vmatpush1.bf16.msra.mxu1 %v1871_v36 }
  0x6f   :  { %1328 = vmatpush1.bf16.msra.mxu0 %v1814_v53  ;;  %1098 = vmatprep.subr.bf16.mxu1 %v1750_v32 }
  0x70   :  { %1330 = vmatprep.subr.bf16.mxu0 %v1817_v54 }
  0x73   :  { %1332 = vmatpush1.bf16.msra.mxu0 %v1822_v61 }
  0x74   :  { %1334 = vmatprep.subr.bf16.mxu0 %v1825_v62 }
  0x77   :  { %1336 = vmatpush1.bf16.msra.mxu0 %v1830_v4 }
  0x78   :  { %1338 = vmatprep.subr.bf16.mxu0 %v1833_v5 }
  0x7b   :  { %1340 = vmatpush1.bf16.msra.mxu0 %v1838_v10 }
  0x7c   :  { %1342 = vmatprep.subr.bf16.mxu0 %v1855_v13 }
  0x7f   :  { %1344 = vmatpush1.bf16.msra.mxu0 %v1857_v17 }
  0x80   :  { %1346 = vmatprep.subr.bf16.mxu0 %v1863_v22 }
  0x83   :  { %1348 = vmatpush1.bf16.msra.mxu0 %v1865_v28 }
  0x84   :  { %1350 = vmatprep.subr.bf16.mxu0 %v1867_v29 }
  0x87   :  { %1352 = vmatpush1.bf16.msra.mxu0 %v1871_v36 }
  0x88   :  { %1354 = vmatprep.subr.bf16.mxu0 %v1750_v32 }
 0x11d   :  { %v228_v41 = vpop.f32.mrb[0].mxu0 }
 0x11e   :  { %1595 = vtanh.f32 %v228_v41  ;;  %v230_v42 = vpop.f32.mrb[1].mxu0 }
 0x121   :  { %v233_v44 = vpop.f32.mrb[2].mxu0 }
 0x122   :  { %v235_v49 = vpop.f32.mrb[3].mxu0 }
 0x125   :  { %v239_v63 = vpop.f32.mrb[4].mxu0 }
 0x126   :  { %v241_v1 = vpop.f32.mrb[5].mxu0 }
 0x128   :  { %v1596_v43 = vpop.eup %1595 }
 0x129   :  { %345 = vmatmul.mubr.f32.vlgmr.msra.gmra.mrb[0].mxu1 %v1596_v43  ;;  %v245_v15 = vpop.f32.mrb[6].mxu0  ;;  %v159_v43 = vld [vmem:[#allocation2 + $0x30] sm:$0xff] }
 0x12a   :  { %1100 = vmatpush1.bf16.msra.mxu1 %v1752_v37  ;;  %v247_v19 = vpop.f32.mrb[7].mxu0  ;;  %262 = vmatmul.mubr.f32.gmra.mrb[12].mxu0 %v159_v43 }
 0x12b   :  { %1102 = vmatprep.subr.bf16.mxu1 %v1754_v38  ;;  %267 = vmatprep.mubr.f32.mxu0 %v1705_v0 }
 0x12d   :  { %v251_v41 = vpop.f32.mrb[8].mxu0 }
 0x12e   :  { %1104 = vmatpush1.bf16.msra.mxu1 %v1758_v45  ;;  %v253_v42 = vpop.f32.mrb[9].mxu0 }
 0x12f   :  { %1106 = vmatprep.subr.bf16.mxu1 %v1761_v48 }
 0x132   :  { %1108 = vmatpush1.bf16.msra.mxu1 %v1764_v57 }
 0x133   :  { %1110 = vmatprep.subr.bf16.mxu1 %v1767_v60 }
 0x136   :  { %1112 = vmatpush1.bf16.msra.mxu1 %v1770_v6 }
 0x137   :  { %1114 = vmatprep.subr.bf16.mxu1 %v1773_v9 }
 0x13a   :  { %1116 = vmatpush1.bf16.msra.mxu1 %v1776_v16 }
 0x13b   :  { %1118 = vmatprep.subr.bf16.mxu1 %v1779_v18 }
 0x13e   :  { %1120 = vmatpush1.bf16.msra.mxu1 %v1782_v23 }
 0x13f   :  { %1122 = vmatprep.subr.bf16.mxu1 %v1785_v25 }
 0x142   :  { %1124 = vmatpush1.bf16.msra.mxu1 %v1789_v30 }
 0x143   :  { %1126 = vmatprep.subr.bf16.mxu1 %v1792_v31 }
 0x146   :  { %1128 = vmatpush1.bf16.msra.mxu1 %v1798_v39 }
 0x147   :  { %1130 = vmatprep.subr.bf16.mxu1 %v1801_v40 }
 0x14a   :  { %1132 = vmatpush1.bf16.msra.mxu1 %v1806_v46 }
 0x14b   :  { %1134 = vmatprep.subr.bf16.mxu1 %v1809_v47 }
 0x14e   :  { %1136 = vmatpush1.bf16.msra.mxu1 %v1814_v53 }
 0x14f   :  { %1138 = vmatprep.subr.bf16.mxu1 %v1817_v54 }
 0x152   :  { %1140 = vmatpush1.bf16.msra.mxu1 %v1822_v61 }
 0x153   :  { %1142 = vmatprep.subr.bf16.mxu1 %v1825_v62 }
 0x156   :  { %1144 = vmatpush1.bf16.msra.mxu1 %v1830_v4 }
 0x157   :  { %1146 = vmatprep.subr.bf16.mxu1 %v1833_v5 }
 0x15a   :  { %1148 = vmatpush1.bf16.msra.mxu1 %v1838_v10 }
 0x15b   :  { %1150 = vmatprep.subr.bf16.mxu1 %v1855_v13 }
 0x15e   :  { %1152 = vmatpush1.bf16.msra.mxu1 %v1857_v17 }
 0x15f   :  { %1154 = vmatprep.subr.bf16.mxu1 %v1863_v22 }
 0x162   :  { %1156 = vmatpush1.bf16.msra.mxu1 %v1865_v28 }
 0x163   :  { %1158 = vmatprep.subr.bf16.mxu1 %v1867_v29 }
 0x166   :  { %1160 = vmatpush1.bf16.msra.mxu1 %v1871_v36 }
 0x167   :  { %1162 = vmatprep.subr.bf16.mxu1 %v1750_v32 }
 0x1fc   :  { %v346_v51 = vpop.f32.mrb[0].mxu1 }
 0x1fd   :  { %v347_v52 = vadd.f32 %v346_v51, %v233_v44  ;;  %v348_v55 = vpop.f32.mrb[1].mxu1  ;;  %v160_v44 = vld [vmem:[#allocation2 + $0x38] sm:$0xff] }
 0x1fe   :  { %v349_v56 = vadd.f32 %v348_v55, %v235_v49  ;;  %268 = vmatmul.mubr.f32.gmra.mrb[14].mxu0 %v160_v44  ;;  %v161_v49 = vld [vmem:[#allocation2 + $0x40] sm:$0xff] }
 0x1ff   :  { %273 = vmatprep.mubr.f32.mxu0 %v1705_v0 }
 0x200   :  { %1597 = vtanh.f32 %v349_v56 }
 0x201   :  { %1599 = vtanh.f32 %v347_v52 }
 0x202   :  { %274 = vmatmul.mubr.f32.gmra.mrb[16].mxu0 %v161_v49 }
 0x20a   :  { %v1598_v58 = vpop.eup %1597 }
 0x20b   :  { %v1600_v59 = vpop.eup %1599  ;;  %417 = vmatprep.mubr.f32.mxu1 %v1598_v58 }
 0x20c   :  { %418 = vmatmul.mubr.f32.vlgmr.msra.gmra.mrb[2].mxu1 %v1600_v59 }
 0x20d   :  { %1164 = vmatpush1.bf16.msra.mxu1 %v1752_v37 }
 0x20e   :  { %1166 = vmatprep.subr.bf16.mxu1 %v1754_v38 }
 0x211   :  { %1168 = vmatpush1.bf16.msra.mxu1 %v1758_v45 }
 0x212   :  { %1170 = vmatprep.subr.bf16.mxu1 %v1761_v48 }
 0x215   :  { %1172 = vmatpush1.bf16.msra.mxu1 %v1764_v57 }
 0x216   :  { %1174 = vmatprep.subr.bf16.mxu1 %v1767_v60 }
 0x219   :  { %1176 = vmatpush1.bf16.msra.mxu1 %v1770_v6 }
 0x21a   :  { %1178 = vmatprep.subr.bf16.mxu1 %v1773_v9 }
 0x21d   :  { %1180 = vmatpush1.bf16.msra.mxu1 %v1776_v16 }
 0x21e   :  { %1182 = vmatprep.subr.bf16.mxu1 %v1779_v18 }
 0x221   :  { %1184 = vmatpush1.bf16.msra.mxu1 %v1782_v23 }
 0x222   :  { %1186 = vmatprep.subr.bf16.mxu1 %v1785_v25 }
 0x225   :  { %1188 = vmatpush1.bf16.msra.mxu1 %v1789_v30 }
 0x226   :  { %1190 = vmatprep.subr.bf16.mxu1 %v1792_v31 }
 0x229   :  { %1192 = vmatpush1.bf16.msra.mxu1 %v1798_v39 }
 0x22a   :  { %1194 = vmatprep.subr.bf16.mxu1 %v1801_v40 }
 0x22d   :  { %1196 = vmatpush1.bf16.msra.mxu1 %v1806_v46 }
 0x22e   :  { %1198 = vmatprep.subr.bf16.mxu1 %v1809_v47 }
 0x231   :  { %1200 = vmatpush1.bf16.msra.mxu1 %v1814_v53 }
 0x232   :  { %1202 = vmatprep.subr.bf16.mxu1 %v1817_v54 }
 0x235   :  { %1204 = vmatpush1.bf16.msra.mxu1 %v1822_v61 }
 0x236   :  { %1206 = vmatprep.subr.bf16.mxu1 %v1825_v62 }
 0x239   :  { %1208 = vmatpush1.bf16.msra.mxu1 %v1830_v4 }
 0x23a   :  { %1210 = vmatprep.subr.bf16.mxu1 %v1833_v5 }
 0x23d   :  { %1212 = vmatpush1.bf16.msra.mxu1 %v1838_v10 }
 0x23e   :  { %1214 = vmatprep.subr.bf16.mxu1 %v1855_v13 }
 0x241   :  { %1216 = vmatpush1.bf16.msra.mxu1 %v1857_v17 }
 0x242   :  { %1218 = vmatprep.subr.bf16.mxu1 %v1863_v22 }
 0x245   :  { %1220 = vmatpush1.bf16.msra.mxu1 %v1865_v28 }
 0x246   :  { %1222 = vmatprep.subr.bf16.mxu1 %v1867_v29 }
 0x249   :  { %1224 = vmatpush1.bf16.msra.mxu1 %v1871_v36 }
 0x24a   :  { %1226 = vmatprep.subr.bf16.mxu1 %v1750_v32 }
 0x2df   :  { %v419_v3 = vpop.f32.mrb[2].mxu1 }
 0x2e0   :  { %v420_v7 = vadd.f32 %v419_v3, %v239_v63  ;;  %v421_v8 = vpop.f32.mrb[3].mxu1 }
 0x2e1   :  { %v422_v11 = vadd.f32 %v421_v8, %v241_v1 }
 0x2e3   :  { %1601 = vtanh.f32 %v422_v11 }
 0x2e4   :  { %1603 = vtanh.f32 %v420_v7 }
 0x2ed   :  { %v1602_v12 = vpop.eup %1601 }
 0x2ee   :  { %v1604_v14 = vpop.eup %1603  ;;  %490 = vmatprep.mubr.f32.mxu1 %v1602_v12  ;;  %v152_v12 = vld [vmem:[#allocation5 + $0x400] sm:$0xff] }
 0x2ef   :  { %491 = vmatmul.mubr.f32.vlgmr.msra.gmra.mrb[4].mxu1 %v1604_v14 }
 0x2f0   :  { %1228 = vmatpush1.bf16.msra.mxu1 %v1752_v37 }
 0x2f1   :  { %1230 = vmatprep.subr.bf16.mxu1 %v1754_v38 }
 0x2f4   :  { %1232 = vmatpush1.bf16.msra.mxu1 %v1758_v45 }
 0x2f5   :  { %1234 = vmatprep.subr.bf16.mxu1 %v1761_v48 }
 0x2f8   :  { %1236 = vmatpush1.bf16.msra.mxu1 %v1764_v57 }
 0x2f9   :  { %1238 = vmatprep.subr.bf16.mxu1 %v1767_v60 }
 0x2fc   :  { %1240 = vmatpush1.bf16.msra.mxu1 %v1770_v6 }
 0x2fd   :  { %1242 = vmatprep.subr.bf16.mxu1 %v1773_v9 }
 0x300   :  { %1244 = vmatpush1.bf16.msra.mxu1 %v1776_v16 }
 0x301   :  { %1246 = vmatprep.subr.bf16.mxu1 %v1779_v18 }
 0x304   :  { %1248 = vmatpush1.bf16.msra.mxu1 %v1782_v23 }
 0x305   :  { %1250 = vmatprep.subr.bf16.mxu1 %v1785_v25 }
 0x308   :  { %1252 = vmatpush1.bf16.msra.mxu1 %v1789_v30 }
 0x309   :  { %1254 = vmatprep.subr.bf16.mxu1 %v1792_v31 }
 0x30c   :  { %1256 = vmatpush1.bf16.msra.mxu1 %v1798_v39 }
 0x30d   :  { %1258 = vmatprep.subr.bf16.mxu1 %v1801_v40 }
 0x310   :  { %1260 = vmatpush1.bf16.msra.mxu1 %v1806_v46 }
 0x311   :  { %1262 = vmatprep.subr.bf16.mxu1 %v1809_v47 }
 0x314   :  { %1264 = vmatpush1.bf16.msra.mxu1 %v1814_v53 }
 0x315   :  { %1266 = vmatprep.subr.bf16.mxu1 %v1817_v54 }
 0x318   :  { %1268 = vmatpush1.bf16.msra.mxu1 %v1822_v61 }
 0x319   :  { %1270 = vmatprep.subr.bf16.mxu1 %v1825_v62 }
 0x31c   :  { %1272 = vmatpush1.bf16.msra.mxu1 %v1830_v4 }
 0x31d   :  { %1274 = vmatprep.subr.bf16.mxu1 %v1833_v5 }
 0x320   :  { %1276 = vmatpush1.bf16.msra.mxu1 %v1838_v10 }
 0x321   :  { %1278 = vmatprep.subr.bf16.mxu1 %v1855_v13 }
 0x324   :  { %1280 = vmatpush1.bf16.msra.mxu1 %v1857_v17 }
 0x325   :  { %1282 = vmatprep.subr.bf16.mxu1 %v1863_v22 }
 0x328   :  { %1284 = vmatpush1.bf16.msra.mxu1 %v1865_v28 }
 0x329   :  { %1286 = vmatprep.subr.bf16.mxu1 %v1867_v29 }
 0x32c   :  { %1288 = vmatpush1.bf16.msra.mxu1 %v1871_v36 }
 0x3c2   :  { %v492_v24 = vpop.f32.mrb[4].mxu1 }
 0x3c3   :  { %v493_v26 = vadd.f32 %v492_v24, %v245_v15  ;;  %v494_v27 = vpop.f32.mrb[5].mxu1 }
 0x3c4   :  { %v495_v33 = vadd.f32 %v494_v27, %v247_v19 }
 0x3c6   :  { %1605 = vtanh.f32 %v495_v33 }
 0x3c7   :  { %1607 = vtanh.f32 %v493_v26 }
 0x3d0   :  { %v1606_v34 = vpop.eup %1605 }
 0x3d1   :  { %v1608_v35 = vpop.eup %1607  ;;  %563 = vmatprep.mubr.f32.mxu1 %v1606_v34 }
 0x3d2   :  { %564 = vmatmul.mubr.f32.vlgmr.msra.gmra.mrb[6].mxu1 %v1608_v35 }
 0x3d3   :  { %998 = vmatprep.mubr.msk.f32.mxu1 %vm1707_vm0, %v1705_v0 }
 0x4a5   :  { %v565_v50 = vpop.f32.mrb[6].mxu1 }
 0x4a6   :  { %v566_v51 = vadd.f32 %v565_v50, %v251_v41  ;;  %v567_v52 = vpop.f32.mrb[7].mxu1 }
 0x4a7   :  { %v568_v55 = vadd.f32 %v567_v52, %v253_v42 }
 0x4a9   :  { %1609 = vtanh.f32 %v568_v55 }
 0x4aa   :  { %1611 = vtanh.f32 %v566_v51 }
 0x4b3   :  { %v1610_v56 = vpop.eup %1609 }
 0x4b4   :  { %v1612_v58 = vpop.eup %1611  ;;  %636 = vmatprep.mubr.f32.mxu0 %v1610_v56 }
 0x4b5   :  { %637 = vmatmul.mubr.f32.vlgmr.msra.gmra.mrb[10].mxu0 %v1612_v58 }
 0x4b6   :  { %1356 = vmatpush1.bf16.msra.mxu0 %v1752_v37 }
 0x4b7   :  { %1358 = vmatprep.subr.bf16.mxu0 %v1754_v38 }
 0x4ba   :  { %1360 = vmatpush1.bf16.msra.mxu0 %v1758_v45 }
 0x4bb   :  { %1362 = vmatprep.subr.bf16.mxu0 %v1761_v48 }
 0x4be   :  { %1364 = vmatpush1.bf16.msra.mxu0 %v1764_v57 }
 0x4bf   :  { %1366 = vmatprep.subr.bf16.mxu0 %v1767_v60 }
 0x4c2   :  { %1368 = vmatpush1.bf16.msra.mxu0 %v1770_v6 }
 0x4c3   :  { %1370 = vmatprep.subr.bf16.mxu0 %v1773_v9 }
 0x4c6   :  { %1372 = vmatpush1.bf16.msra.mxu0 %v1776_v16 }
 0x4c7   :  { %1374 = vmatprep.subr.bf16.mxu0 %v1779_v18 }
 0x4ca   :  { %1376 = vmatpush1.bf16.msra.mxu0 %v1782_v23 }
 0x4cb   :  { %1378 = vmatprep.subr.bf16.mxu0 %v1785_v25 }
 0x4ce   :  { %1380 = vmatpush1.bf16.msra.mxu0 %v1789_v30 }
 0x4cf   :  { %1382 = vmatprep.subr.bf16.mxu0 %v1792_v31 }
 0x4d2   :  { %1384 = vmatpush1.bf16.msra.mxu0 %v1798_v39 }
 0x4d3   :  { %1386 = vmatprep.subr.bf16.mxu0 %v1801_v40 }
 0x4d6   :  { %1388 = vmatpush1.bf16.msra.mxu0 %v1806_v46 }
 0x4d7   :  { %1390 = vmatprep.subr.bf16.mxu0 %v1809_v47 }
 0x4da   :  { %1392 = vmatpush1.bf16.msra.mxu0 %v1814_v53 }
 0x4db   :  { %1394 = vmatprep.subr.bf16.mxu0 %v1817_v54 }
 0x4de   :  { %1396 = vmatpush1.bf16.msra.mxu0 %v1822_v61 }
 0x4df   :  { %1398 = vmatprep.subr.bf16.mxu0 %v1825_v62 }
 0x4e2   :  { %1400 = vmatpush1.bf16.msra.mxu0 %v1830_v4 }
 0x4e3   :  { %1402 = vmatprep.subr.bf16.mxu0 %v1833_v5 }
 0x4e6   :  { %1404 = vmatpush1.bf16.msra.mxu0 %v1838_v10 }
 0x4e7   :  { %1406 = vmatprep.subr.bf16.mxu0 %v1855_v13 }
 0x4ea   :  { %1408 = vmatpush1.bf16.msra.mxu0 %v1857_v17 }
 0x4eb   :  { %1410 = vmatprep.subr.bf16.mxu0 %v1863_v22 }
 0x4ee   :  { %1412 = vmatpush1.bf16.msra.mxu0 %v1865_v28 }
 0x4ef   :  { %1414 = vmatprep.subr.bf16.mxu0 %v1867_v29 }
 0x4f2   :  { %1416 = vmatpush1.bf16.msra.mxu0 %v1871_v36 }
 0x4f3   :  { %1418 = vmatprep.subr.bf16.mxu0 %v1750_v32 }
 0x588   :  { %v638_v59 = vpop.f32.mrb[10].mxu0 }
 0x589   :  { %v640_v63 = vpop.f32.mrb[11].mxu0 }
 0x58a   :  { %1613 = vtanh.f32 %v640_v63 }
 0x58b   :  { %1615 = vtanh.f32 %v638_v59 }
 0x594   :  { %v1614_v1 = vpop.eup %1613 }
 0x595   :  { %v1616_v2 = vpop.eup %1615  ;;  %709 = vmatprep.mubr.f32.mxu0 %v1614_v1 }
 0x596   :  { %710 = vmatmul.mubr.f32.vlgmr.msra.gmra.mrb[12].mxu0 %v1616_v2 }
 0x597   :  { %1420 = vmatpush1.bf16.msra.mxu0 %v1752_v37 }
 0x598   :  { %1422 = vmatprep.subr.bf16.mxu0 %v1754_v38 }
 0x59b   :  { %1424 = vmatpush1.bf16.msra.mxu0 %v1758_v45 }
 0x59c   :  { %1426 = vmatprep.subr.bf16.mxu0 %v1761_v48 }
 0x59f   :  { %1428 = vmatpush1.bf16.msra.mxu0 %v1764_v57 }
 0x5a0   :  { %1430 = vmatprep.subr.bf16.mxu0 %v1767_v60 }
 0x5a3   :  { %1432 = vmatpush1.bf16.msra.mxu0 %v1770_v6 }
 0x5a4   :  { %1434 = vmatprep.subr.bf16.mxu0 %v1773_v9 }
 0x5a7   :  { %1436 = vmatpush1.bf16.msra.mxu0 %v1776_v16 }
 0x5a8   :  { %1438 = vmatprep.subr.bf16.mxu0 %v1779_v18 }
 0x5ab   :  { %1440 = vmatpush1.bf16.msra.mxu0 %v1782_v23 }
 0x5ac   :  { %1442 = vmatprep.subr.bf16.mxu0 %v1785_v25 }
 0x5af   :  { %1444 = vmatpush1.bf16.msra.mxu0 %v1789_v30 }
 0x5b0   :  { %1446 = vmatprep.subr.bf16.mxu0 %v1792_v31 }
 0x5b3   :  { %1448 = vmatpush1.bf16.msra.mxu0 %v1798_v39 }
 0x5b4   :  { %1450 = vmatprep.subr.bf16.mxu0 %v1801_v40 }
 0x5b7   :  { %1452 = vmatpush1.bf16.msra.mxu0 %v1806_v46 }
 0x5b8   :  { %1454 = vmatprep.subr.bf16.mxu0 %v1809_v47 }
 0x5bb   :  { %1456 = vmatpush1.bf16.msra.mxu0 %v1814_v53 }
 0x5bc   :  { %1458 = vmatprep.subr.bf16.mxu0 %v1817_v54 }
 0x5bf   :  { %1460 = vmatpush1.bf16.msra.mxu0 %v1822_v61 }
 0x5c0   :  { %1462 = vmatprep.subr.bf16.mxu0 %v1825_v62 }
 0x5c3   :  { %1464 = vmatpush1.bf16.msra.mxu0 %v1830_v4 }
 0x5c4   :  { %1466 = vmatprep.subr.bf16.mxu0 %v1833_v5 }
 0x5c7   :  { %1468 = vmatpush1.bf16.msra.mxu0 %v1838_v10 }
 0x5c8   :  { %1470 = vmatprep.subr.bf16.mxu0 %v1855_v13 }
 0x5cb   :  { %1472 = vmatpush1.bf16.msra.mxu0 %v1857_v17 }
 0x5cc   :  { %1474 = vmatprep.subr.bf16.mxu0 %v1863_v22 }
 0x5cf   :  { %1476 = vmatpush1.bf16.msra.mxu0 %v1865_v28 }
 0x5d0   :  { %1478 = vmatprep.subr.bf16.mxu0 %v1867_v29 }
 0x5d3   :  { %1480 = vmatpush1.bf16.msra.mxu0 %v1871_v36 }
 0x5d4   :  { %1482 = vmatprep.subr.bf16.mxu0 %v1750_v32  ;;  %v136_v32 = vld [vmem:[#allocation5 + $0x300] sm:$0xff] }
 0x669   :  { %v711_v3 = vpop.f32.mrb[12].mxu0 }
 0x66a   :  { %v713_v7 = vpop.f32.mrb[13].mxu0 }
 0x66b   :  { %1617 = vtanh.f32 %v713_v7 }
 0x66c   :  { %1619 = vtanh.f32 %v711_v3 }
 0x675   :  { %v1618_v8 = vpop.eup %1617 }
 0x676   :  { %v1620_v11 = vpop.eup %1619  ;;  %782 = vmatprep.mubr.f32.mxu0 %v1618_v8 }
 0x677   :  { %783 = vmatmul.mubr.f32.vlgmr.msra.gmra.mrb[14].mxu0 %v1620_v11 }
 0x678   :  { %1484 = vmatpush1.bf16.msra.mxu0 %v1752_v37  ;;  %v137_v37 = vld [vmem:[#allocation5 + $0x310] sm:$0xff] }
 0x679   :  { %1486 = vmatprep.subr.bf16.mxu0 %v1754_v38  ;;  %v138_v38 = vld [vmem:[#allocation5 + $0x320] sm:$0xff] }
 0x67c   :  { %1488 = vmatpush1.bf16.msra.mxu0 %v1758_v45  ;;  %v1706_v45 = vmov 0.0|0.0  }
 0x67d   :  { %1490 = vmatprep.subr.bf16.mxu0 %v1761_v48  ;;  %1545 = vmatprep.subr.bf16.mxu1 %v1706_v45  ;;  %v1546_v48 = vpack.c.bf16 %v137_v37, %v136_v32 }
 0x67f   :  { %1547 = vmatpush3.bf16.msra.mxu1 %v1546_v48 }
 0x680   :  { %1492 = vmatpush1.bf16.msra.mxu0 %v1764_v57  ;;  %v139_v57 = vld [vmem:[#allocation5 + $0x330] sm:$0xff]  ;;  %1548 = vmatprep.subr.bf16.mxu1 %v1706_v45 }
 0x681   :  { %1494 = vmatprep.subr.bf16.mxu0 %v1767_v60  ;;  %v1549_v60 = vpack.c.bf16 %v139_v57, %v138_v38 }
 0x683   :  { %1550 = vmatpush3.bf16.msra.mxu1 %v1549_v60 }
 0x684   :  { %1496 = vmatpush1.bf16.msra.mxu0 %v1770_v6  ;;  %v140_v6 = vld [vmem:[#allocation5 + $0x340] sm:$0xff]  ;;  %1551 = vmatprep.subr.bf16.mxu1 %v1706_v45 }
 0x685   :  { %1498 = vmatprep.subr.bf16.mxu0 %v1773_v9  ;;  %v141_v9 = vld [vmem:[#allocation5 + $0x350] sm:$0xff] }
 0x688   :  { %1500 = vmatpush1.bf16.msra.mxu0 %v1776_v16  ;;  %v1552_v16 = vpack.c.bf16 %v141_v9, %v140_v6 }
 0x689   :  { %1502 = vmatprep.subr.bf16.mxu0 %v1779_v18  ;;  %v142_v18 = vld [vmem:[#allocation5 + $0x360] sm:$0xff] }
 0x68a   :  { %1553 = vmatpush3.bf16.msra.mxu1 %v1552_v16 }
 0x68b   :  { %1554 = vmatprep.subr.bf16.mxu1 %v1706_v45 }
 0x68c   :  { %1504 = vmatpush1.bf16.msra.mxu0 %v1782_v23  ;;  %v143_v23 = vld [vmem:[#allocation5 + $0x370] sm:$0xff] }
 0x68d   :  { %1506 = vmatprep.subr.bf16.mxu0 %v1785_v25  ;;  %v1555_v25 = vpack.c.bf16 %v143_v23, %v142_v18 }
 0x68f   :  { %1556 = vmatpush3.bf16.msra.mxu1 %v1555_v25 }
 0x690   :  { %1508 = vmatpush1.bf16.msra.mxu0 %v1789_v30  ;;  %v144_v30 = vld [vmem:[#allocation5 + $0x380] sm:$0xff]  ;;  %1557 = vmatprep.subr.bf16.mxu1 %v1706_v45 }
 0x691   :  { %1510 = vmatprep.subr.bf16.mxu0 %v1792_v31  ;;  %v145_v31 = vld [vmem:[#allocation5 + $0x390] sm:$0xff] }
 0x694   :  { %1512 = vmatpush1.bf16.msra.mxu0 %v1798_v39  ;;  %v1558_v39 = vpack.c.bf16 %v145_v31, %v144_v30 }
 0x695   :  { %1514 = vmatprep.subr.bf16.mxu0 %v1801_v40 }
 0x696   :  { %1559 = vmatpush3.bf16.msra.mxu1 %v1558_v39 }
 0x697   :  { %1560 = vmatprep.subr.bf16.mxu1 %v1706_v45 }
 0x698   :  { %1516 = vmatpush1.bf16.msra.mxu0 %v1806_v46 }
 0x699   :  { %1518 = vmatprep.subr.bf16.mxu0 %v1809_v47 }
 0x69c   :  { %1520 = vmatpush1.bf16.msra.mxu0 %v1814_v53 }
 0x69d   :  { %1522 = vmatprep.subr.bf16.mxu0 %v1817_v54  ;;  %v146_v54 = vld [vmem:[#allocation5 + $0x3a0] sm:$0xff] }
 0x6a0   :  { %1524 = vmatpush1.bf16.msra.mxu0 %v1822_v61  ;;  %v147_v61 = vld [vmem:[#allocation5 + $0x3b0] sm:$0xff] }
 0x6a1   :  { %1526 = vmatprep.subr.bf16.mxu0 %v1825_v62  ;;  %v1561_v62 = vpack.c.bf16 %v147_v61, %v146_v54 }
 0x6a3   :  { %1562 = vmatpush3.bf16.msra.mxu1 %v1561_v62 }
 0x6a4   :  { %1528 = vmatpush1.bf16.msra.mxu0 %v1830_v4  ;;  %v148_v4 = vld [vmem:[#allocation5 + $0x3c0] sm:$0xff]  ;;  %1563 = vmatprep.subr.bf16.mxu1 %v1706_v45 }
 0x6a5   :  { %1530 = vmatprep.subr.bf16.mxu0 %v1833_v5  ;;  %v149_v5 = vld [vmem:[#allocation5 + $0x3d0] sm:$0xff] }
 0x6a8   :  { %1532 = vmatpush1.bf16.msra.mxu0 %v1838_v10  ;;  %v1564_v10 = vpack.c.bf16 %v149_v5, %v148_v4 }
 0x6a9   :  { %1534 = vmatprep.subr.bf16.mxu0 %v1855_v13  ;;  %v150_v13 = vld [vmem:[#allocation5 + $0x3e0] sm:$0xff] }
 0x6aa   :  { %1565 = vmatpush3.bf16.msra.mxu1 %v1564_v10 }
 0x6ab   :  { %1566 = vmatprep.subr.bf16.mxu1 %v1706_v45 }
 0x6ac   :  { %1536 = vmatpush1.bf16.msra.mxu0 %v1857_v17  ;;  %v151_v17 = vld [vmem:[#allocation5 + $0x3f0] sm:$0xff] }
 0x6ad   :  { %1538 = vmatprep.subr.bf16.mxu0 %v1863_v22  ;;  %v1567_v22 = vpack.c.bf16 %v151_v17, %v150_v13 }
 0x6af   :  { %1568 = vmatpush3.bf16.msra.mxu1 %v1567_v22 }
 0x6b0   :  { %1540 = vmatpush1.bf16.msra.mxu0 %v1865_v28 }
 0x6b1   :  { %1542 = vmatprep.subr.bf16.mxu0 %v1867_v29 }
 0x6b4   :  { %1544 = vmatpush1.bf16.msra.mxu0 %v1871_v36 }
 0x74a   :  { %v784_v40 = vpop.f32.mrb[14].mxu0 }
 0x74b   :  { %v786_v46 = vpop.f32.mrb[15].mxu0 }
 0x74c   :  { %1621 = vtanh.f32 %v786_v46 }
 0x74d   :  { %1623 = vtanh.f32 %v784_v40 }
 0x756   :  { %v1622_v47 = vpop.eup %1621 }
 0x757   :  { %v1624_v53 = vpop.eup %1623  ;;  %855 = vmatprep.mubr.f32.mxu0 %v1622_v47 }
 0x758   :  { %856 = vmatmul.mubr.f32.vlgmr.msra.gmra.mrb[16].mxu0 %v1624_v53 }
 0x82b   :  { %v857_v28 = vpop.f32.mrb[16].mxu0 }
 0x82c   :  { %v858_v29 = vpop.f32.mrb[17].mxu0 }
 0x82d   :  { %1625 = vtanh.f32 %v858_v29 }
 0x837   :  { %v1626_v36 = vpop.eup %1625 }
 0x838   :  { %999 = vmatmul.mubr.f32.vlgmr.msra.gmra.mrb[8].mxu1 %v1626_v36 }
 0x90b   :  { %v928_v14 = vpop.f32.mrb[8].mxu1 }
 0x90c   :  { %v929_v15 = vadd.f32 %v928_v14, %v152_v12  ;;  %v1000_v19 = vpop.f32.mrb[9].mxu1 }
 0x90e   :  { %932 = vst [vmem:[#allocation7] sm:$0xff] %v929_v15 }
 0x90f   :  { %1682 = shalt.err (!%p1679_p6)
}
 0x910   :  { %s1683_s12 = scalar_lea.hbm %s2093_s2, 128 }
 0x911   :  { %p1684_p7 = scmp.ne.s32.totalorder %s2093_s2, %s1683_s12  ;;  %p1687_p8 = scmp.lt.u32.totalorder %s1683_s12, %s2093_s2 }
 0x913   :  { %p1689_p9 = pnand %p1687_p8, %p1684_p7 }
 0x915   :  { %1692 = shalt.err (!%p1689_p9)
}
 0x916   :  { %942 = dma.vmem_to_hbm [thread:$0]  %s940_s8, 128, %s2093_s2, [#allocation4]  }
 0x917   :  { %1697 = dma.done.wait [#allocation4], 128  }
 0x918   :  { %1698 = vsyncadd [#allocation4], 4294967168 }
 0x919   :  { %946 = vsyncpa [#allocation3], 1 }
 0x91a   :  { %947 = vsyncpa [#allocation6], 1 }
 0x91b   :  { %948 = vsyncpa [#allocation4], 1 }

</bundles_post_ra>
